<compile_context>
chip_gen: v6e
topology: v6e:2x2x1
jax: 0.10.0
libtpu: 0.0.40
codegen_flags: <defaults>
</compile_context>

<pallas_src>
import functools

import jax
import jax.numpy as jnp
from jax.experimental import pallas as pl
from jax.experimental.pallas import tpu as pltpu

TN = 128         # lane dimension
MAX_TM = 1024    # sublane rows per block: (1024, 128) f32 = 512 KiB / input block


def _tensorcores_per_chip():
    """Best-effort TensorCores per JAX device (v7x / v4 / v5p megacore -> 2)."""
    try:
        kind = jax.devices()[0].device_kind.lower()
    except Exception:
        return 1
    if "lite" in kind or "v5e" in kind or "v6" in kind:
        return 1
    if "v7" in kind or "v4" in kind or "v5p" in kind:
        return 2
    return 1


def _int_pow(v, g: int):
    if g == 0:
        return jnp.ones_like(v)
    r = v
    for _ in range(g - 1):
        r = r * v
    return r


def _focal_sum_kernel(x_ref, t_ref, o_ref, acc_ref, *, alpha, gamma,
                      n_blocks, has_phantom):
    i = pl.program_id(1)             # sequential reduction axis
    inner = pl.num_programs(1)

    @pl.when(i == 0)
    def _init():
        acc_ref[...] = jnp.zeros_like(acc_ref)

    def _accumulate():
        x = x_ref[...].astype(jnp.float32)
        t = t_ref[...].astype(jnp.float32)

        # Numerically-stable log-sigmoid:
        #   log(p)   = min(x, 0) - log(1 + exp(-|x|))
        #   log(1-p) = log(p) - x
        e = jnp.exp(-jnp.abs(x))
        one_plus_e = 1.0 + e
        log_p = jnp.minimum(x, 0.0) - jnp.log(one_plus_e)
        log_1mp = log_p - x

        # p and (1-p) from e: approx EUP reciprocal instead of a second
        # sigmoid transcendental; one Newton step restores full f32 accuracy
        # for ~2 extra VALU ops.
        inv = pl.reciprocal(one_plus_e, approx=True)
        inv = inv * (2.0 - one_plus_e * inv)
        em = e * inv
        p = jnp.where(x >= 0.0, inv, em)
        one_minus_p = jnp.where(x >= 0.0, em, inv)

        # Integer gamma (default 2): repeated VPU multiplies, no exp/log pow.
        if float(gamma) == int(gamma) and 0 <= int(gamma) <= 8:
            pow_1mp = _int_pow(one_minus_p, int(gamma))
            pow_p = _int_pow(p, int(gamma))
        else:
            pow_1mp = one_minus_p ** float(gamma)
            pow_p = p ** float(gamma)

        loss = (-alpha * pow_1mp * t * log_p
                - (1.0 - alpha) * pow_p * (1.0 - t) * log_1mp)

        # (tm, 128) -> (8, 128): pure vreg-vreg adds; accumulator stays a
        # single 4 KiB tile (1 vld + 1 vst per step instead of tm/8 each).
        acc_ref[...] += loss.reshape(-1, 8, TN).sum(axis=0)

    if has_phantom:
        gb = pl.program_id(0) * inner + i
        @pl.when(gb < n_blocks)       # skip the clamped phantom step
        def _guarded():
            _accumulate()
    else:
        _accumulate()

    @pl.when(i == inner - 1)
    def _finalize():
        o_ref[...] = acc_ref[...]     # (8,128) per-core partial; summed in wrapper


def _focal_sum_tail(x, t, alpha, gamma):
    """Plain-jnp sum of the < one-block tail (tiny; avoids padding full inputs)."""
    x = x.astype(jnp.float32)
    t = t.astype(jnp.float32)
    e = jnp.exp(-jnp.abs(x))
    log_p = jnp.minimum(x, 0.0) - jnp.log1p(e)
    log_1mp = log_p - x
    p = jax.nn.sigmoid(x)
    g = float(gamma)
    loss = (-alpha * (1.0 - p) ** g * t * log_p
            - (1.0 - alpha) * p ** g * (1.0 - t) * log_1mp)
    return jnp.sum(loss, dtype=jnp.float32)


def focal_loss(logits, target, gamma=2, alpha=0.75, reduction='mean', *,
               num_cores=None, block_rows=MAX_TM):
    assert logits.shape == target.shape
    assert block_rows >= 8 and block_rows % 8 == 0
    total = int(logits.size)
    assert total > 0

    # Native dtype straight into the kernel (cast happens in VMEM).
    x_flat = jnp.ravel(logits)
    t_flat = jnp.ravel(target)

    rows_full = total // TN                 # complete 128-wide rows
    rows8 = (rows_full // 8) * 8            # sublane-aligned rows the kernel takes
    if rows8 > 0:
        n_blocks = pl.cdiv(rows8, block_rows)
        tm = (rows8 // n_blocks) // 8 * 8   # block height (multiple of 8, <= block_rows)
        n_blocks = rows8 // tm
    else:
        n_blocks, tm = 0, 0
    k_rows = n_blocks * tm
    k_elems = k_rows * TN

    partial_sums = []

    if n_blocks > 0:
        nc_avail = _tensorcores_per_chip() if num_cores is None else int(num_cores)
        nc = 2 if (nc_avail >= 2 and n_blocks >= 2) else 1
        inner = pl.cdiv(n_blocks, nc)
        has_phantom = nc * inner != n_blocks

        # Zero-offset slice + reshape of the contiguous flat view: no pad copy.
        x2 = x_flat[:k_elems].reshape(k_rows, TN)
        t2 = t_flat[:k_elems].reshape(k_rows, TN)

        def in_map(c, i, inner=inner, nb=n_blocks, clamp=has_phantom):
            b = c * inner + i
            if clamp:                         # keep the phantom step's DMA in bounds
                b = jnp.minimum(b, nb - 1)
            return (b, 0)

        kernel = functools.partial(
            _focal_sum_kernel, alpha=float(alpha), gamma=gamma,
            n_blocks=n_blocks, has_phantom=has_phantom)

        partials = pl.pallas_call(
            kernel,
            out_shape=jax.ShapeDtypeStruct((nc * 8, TN), jnp.float32),
            grid_spec=pltpu.PrefetchScalarGridSpec(
                num_scalar_prefetch=0,
                grid=(nc, inner),
                in_specs=[pl.BlockSpec((tm, TN), in_map),
                          pl.BlockSpec((tm, TN), in_map)],
                out_specs=pl.BlockSpec((8, TN), lambda c, i: (c, 0)),
                scratch_shapes=[pltpu.VMEM((8, TN), jnp.float32)],
            ),
            compiler_params=pltpu.CompilerParams(
                dimension_semantics=("parallel", "arbitrary")),
        )(x2, t2)
        partial_sums.append(jnp.sum(partials, dtype=jnp.float32))

    if k_elems < total:
        partial_sums.append(
            _focal_sum_tail(x_flat[k_elems:], t_flat[k_elems:], float(alpha), gamma))

    loss_sum = functools.reduce(lambda a, b: a + b, partial_sums)

    if reduction == 'mean':
        return loss_sum / jnp.float32(total)
    if reduction == 'sum':
        return loss_sum
    # TODO(synk): reduction='none' (elementwise output) not wired into this
    # sum-accumulating kernel; the module default is 'mean'.
    raise NotImplementedError(reduction)


def _focal_loss_ref(logits, target, gamma=2, alpha=0.75):
    p = jax.nn.sigmoid(logits.astype(jnp.float32))
    t = target.astype(jnp.float32)
    loss = (-alpha * (1.0 - p) ** gamma * t * jnp.log(p)
            - (1.0 - alpha) * p ** gamma * (1.0 - t) * jnp.log(1.0 - p))
    return loss.mean()


if __name__ == "__main__":
    key = jax.random.PRNGKey(0)

    def _check(shape, **kwargs):
        k1, k2 = jax.random.split(jax.random.fold_in(key, sum(shape)))
        logits = jax.random.normal(k1, shape, dtype=jnp.float32)
        target = (jax.random.uniform(k2, shape) > 0.5).astype(jnp.float32)
        out = focal_loss(logits, target, gamma=2, alpha=0.75,
                         reduction='mean', **kwargs)
        out = jax.block_until_ready(out)
        ref = _focal_loss_ref(logits, target)
        assert jnp.allclose(out, ref, rtol=1e-4, atol=1e-6), (shape, out, ref)

    # Primary small NCHW case (B=2, C=4, H=W=16): one kernel block, no tail.
    _check((2, 4, 16, 16))
    # Tiny ragged size: entirely handled by the jnp tail path.
    _check((2, 3, 7, 5))
    # Ragged size with a kernel-covered prefix plus a small jnp tail.
    _check((3, 5, 64, 100))
    # Larger aligned case: full-height blocks.
    _check((2, 8, 128, 128))
    # Multi-block case: exercises sequential accumulation across grid steps.
    _check((2, 12, 128, 128))
    # Odd block count with a forced 2-way core split: exercises the clamped
    # index_map and the pl.when phantom-step guard on any chip.
    _check((2, 4, 16, 24), num_cores=2, block_rows=8)

    print("KERNEL_OK")
</pallas_src>

<mosaic_0001>
module attributes {stable_mosaic.version = 11 : i64} {
  func.func @_focal_sum_kernel(%arg0: i32, %arg1: i32, %arg2: memref<16x128xf32, #tpu.memory_space<vmem>>, %arg3: memref<16x128xf32, #tpu.memory_space<vmem>>, %arg4: memref<8x128xf32, #tpu.memory_space<vmem>>, %arg5: memref<8x128xf32, #tpu.memory_space<vmem>>) attributes {dimension_semantics = [#tpu.dimension_semantics<parallel>, #tpu.dimension_semantics<arbitrary>], iteration_bounds = array<i64: 1, 1>, scalar_prefetch = 0 : i64, scratch_operands = 1 : i64, tpu.core_type = #tpu.core_type<tc>, window_params = [{transform_indices = @transform_0, window_bounds = array<i64: 16, 128>}, {transform_indices = @transform_1, window_bounds = array<i64: 16, 128>}, {transform_indices = @transform_2, window_bounds = array<i64: 8, 128>}]} {
    %c0_i32 = arith.constant 0 : i32
    %0 = arith.cmpi eq, %arg1, %c0_i32 : i32
    %1 = arith.extui %0 : i1 to i32
    %c0_i32_0 = arith.constant 0 : i32
    %2 = arith.cmpi ne, %1, %c0_i32_0 : i32
    scf.if %2 {
      %cst_19 = arith.constant 0.000000e+00 : f32
      %49 = vector.broadcast %cst_19 : f32 to vector<8x128xf32>
      %c0_20 = arith.constant 0 : index
      %c0_21 = arith.constant 0 : index
      %50 = vector.load %arg5[%c0_20, %c0_21] : memref<8x128xf32, #tpu.memory_space<vmem>>, vector<8x128xf32>
      tpu.vector_store %arg5[%c0_20, %c0_21], %49 {strides = array<i32>} : memref<8x128xf32, #tpu.memory_space<vmem>>, vector<8x128xf32>,
    } else {
    }
    %c0 = arith.constant 0 : index
    %c0_1 = arith.constant 0 : index
    %3 = vector.load %arg2[%c0, %c0_1] : memref<16x128xf32, #tpu.memory_space<vmem>>, vector<16x128xf32>
    %c0_2 = arith.constant 0 : index
    %c0_3 = arith.constant 0 : index
    %4 = vector.load %arg3[%c0_2, %c0_3] : memref<16x128xf32, #tpu.memory_space<vmem>>, vector<16x128xf32>
    %5 = math.absf %3 : vector<16x128xf32>
    %cst = arith.constant 0.000000e+00 : f32
    %6 = vector.broadcast %cst : f32 to vector<16x128xf32>
    %7 = arith.subf %6, %5 : vector<16x128xf32>
    %8 = math.exp %7 : vector<16x128xf32>
    %cst_4 = arith.constant 1.000000e+00 : f32
    %9 = vector.broadcast %cst_4 : f32 to vector<16x128xf32>
    %10 = arith.addf %9, %8 : vector<16x128xf32>
    %cst_5 = arith.constant 0.000000e+00 : f32
    %11 = vector.broadcast %cst_5 : f32 to vector<16x128xf32>
    %12 = arith.minimumf %3, %11 : vector<16x128xf32>
    %13 = math.log %10 : vector<16x128xf32>
    %14 = arith.subf %12, %13 : vector<16x128xf32>
    %15 = arith.subf %14, %3 : vector<16x128xf32>
    %16 = tpu.reciprocal %10 {approx = true} : vector<16x128xf32> -> vector<16x128xf32>
    %17 = arith.mulf %10, %16 : vector<16x128xf32>
    %cst_6 = arith.constant 2.000000e+00 : f32
    %18 = vector.broadcast %cst_6 : f32 to vector<16x128xf32>
    %19 = arith.subf %18, %17 : vector<16x128xf32>
    %20 = arith.mulf %16, %19 : vector<16x128xf32>
    %21 = arith.mulf %8, %20 : vector<16x128xf32>
    %cst_7 = arith.constant 0.000000e+00 : f32
    %22 = vector.broadcast %cst_7 : f32 to vector<16x128xf32>
    %23 = arith.cmpf oge, %3, %22 : vector<16x128xf32>
    %24 = arith.select %23, %20, %21 : vector<16x128xi1>, vector<16x128xf32>
    %cst_8 = arith.constant 0.000000e+00 : f32
    %25 = vector.broadcast %cst_8 : f32 to vector<16x128xf32>
    %26 = arith.cmpf oge, %3, %25 : vector<16x128xf32>
    %27 = arith.select %26, %21, %20 : vector<16x128xi1>, vector<16x128xf32>
    %28 = arith.mulf %27, %27 : vector<16x128xf32>
    %29 = arith.mulf %24, %24 : vector<16x128xf32>
    %cst_9 = arith.constant -7.500000e-01 : f32
    %30 = vector.broadcast %cst_9 : f32 to vector<16x128xf32>
    %31 = arith.mulf %30, %28 : vector<16x128xf32>
    %32 = arith.mulf %31, %4 : vector<16x128xf32>
    %33 = arith.mulf %32, %14 : vector<16x128xf32>
    %cst_10 = arith.constant 2.500000e-01 : f32
    %34 = vector.broadcast %cst_10 : f32 to vector<16x128xf32>
    %35 = arith.mulf %34, %29 : vector<16x128xf32>
    %cst_11 = arith.constant 1.000000e+00 : f32
    %36 = vector.broadcast %cst_11 : f32 to vector<16x128xf32>
    %37 = arith.subf %36, %4 : vector<16x128xf32>
    %38 = arith.mulf %35, %37 : vector<16x128xf32>
    %39 = arith.mulf %38, %15 : vector<16x128xf32>
    %40 = arith.subf %33, %39 : vector<16x128xf32>
    %c0_12 = arith.constant 0 : index
    %c0_13 = arith.constant 0 : index
    %41 = vector.load %arg5[%c0_12, %c0_13] : memref<8x128xf32, #tpu.memory_space<vmem>>, vector<8x128xf32>
    %42 = vector.shape_cast %40 : vector<16x128xf32> to vector<2x8x128xf32>
    %cst_14 = arith.constant dense<0.000000e+00> : vector<8x128xf32>
    %43 = vector.multi_reduction <add>, %42, %cst_14 [0] : vector<2x8x128xf32> to vector<8x128xf32>
    %44 = arith.addf %41, %43 : vector<8x128xf32>
    %c0_15 = arith.constant 0 : index
    %c0_16 = arith.constant 0 : index
    %45 = vector.load %arg5[%c0_15, %c0_16] : memref<8x128xf32, #tpu.memory_space<vmem>>, vector<8x128xf32>
    tpu.vector_store %arg5[%c0_15, %c0_16], %44 {strides = array<i32>} : memref<8x128xf32, #tpu.memory_space<vmem>>, vector<8x128xf32>,
    %c0_i32_17 = arith.constant 0 : i32
    %46 = arith.cmpi eq, %arg1, %c0_i32_17 : i32
    %47 = arith.extui %46 : i1 to i32
    %c0_i32_18 = arith.constant 0 : i32
    %48 = arith.cmpi ne, %47, %c0_i32_18 : i32
    scf.if %48 {
      %c0_19 = arith.constant 0 : index
      %c0_20 = arith.constant 0 : index
      %49 = vector.load %arg5[%c0_19, %c0_20] : memref<8x128xf32, #tpu.memory_space<vmem>>, vector<8x128xf32>
      %c0_21 = arith.constant 0 : index
      %c0_22 = arith.constant 0 : index
      %50 = vector.load %arg4[%c0_21, %c0_22] : memref<8x128xf32, #tpu.memory_space<vmem>>, vector<8x128xf32>
      tpu.vector_store %arg4[%c0_21, %c0_22], %49 {strides = array<i32>} : memref<8x128xf32, #tpu.memory_space<vmem>>, vector<8x128xf32>,
    } else {
    }
    return
  }
  func.func @transform_0(%arg0: i32, %arg1: i32) -> (i32, i32) {
    %c1_i32 = arith.constant 1 : i32
    %0 = arith.muli %arg0, %c1_i32 : i32
    %1 = arith.addi %0, %arg1 : i32
    %c0_i32 = arith.constant 0 : i32
    %c0_i32_0 = arith.constant 0 : i32
    return %1, %c0_i32 : i32, i32
  }
  func.func @transform_1(%arg0: i32, %arg1: i32) -> (i32, i32) {
    %c1_i32 = arith.constant 1 : i32
    %0 = arith.muli %arg0, %c1_i32 : i32
    %1 = arith.addi %0, %arg1 : i32
    %c0_i32 = arith.constant 0 : i32
    %c0_i32_0 = arith.constant 0 : i32
    return %1, %c0_i32 : i32, i32
  }
  func.func @transform_2(%arg0: i32, %arg1: i32) -> (i32, i32) {
    %c0_i32 = arith.constant 0 : i32
    %c0_i32_0 = arith.constant 0 : i32
    return %arg0, %c0_i32 : i32, i32
  }
}

</mosaic_0001>

<bundles_post_ra>
// kernel: tpu_custom_call.1
= control target key start
LH: loop header
LB: loop body
LE: loop exit
PB: predicated region body
PF: predicated region fallthrough
CT: control target
= control target key end

     0   :  { %7 = vsyncpa [#allocation4], 0  ;;  %s260_s0 = inlined_call_operand.hbm [shape: f32[16,128], index: 0, kind: input, shape index: {}]   ;;  %s261_s1 = inlined_call_operand.hbm [shape: f32[16,128], index: 1, kind: input, shape index: {}]   ;;  %s262_s2 = inlined_call_operand.hbm [shape: f32[8,128], index: 2, kind: output, shape index: {}]  }
   0x1   :  { %8 = vsyncpa [#allocation7], 0 }
   0x2   :  { %9 = vsyncpa [#allocation5], 0  ;;  %s225_s9 = smov [#allocation3]  }
   0x3   :  { %s19_s10 = sshll.u32 %s225_s9, 4  ;;  %s20_s10 = int_to_ptr.vmem [resolvable:$true] %s19_s10 }
   0x4   :  { %s167_s11 = scalar_lea.vmem %s20_s10, 256  ;;  %p172_p1 = scmp.lt.s32.totalorder %s20_s10, %s20_s10 }
   0x5   :  { %p168_p0 = scmp.ne.s32.totalorder %s20_s10, %s167_s11  ;;  %p173_p2 = scmp.lt.s32.totalorder %s167_s11, %s167_s11 }
   0x7   :  { %p174_p3 = por %p173_p2, %p172_p1 }
   0x9   :  { %p175_p4 = pnand %p174_p3, %p168_p0 }
   0xb   :  { %178 = shalt.err (!%p175_p4)
}
   0xc   :  { %s226_s12 = smov 128   ;;  %s227_s13 = smov 8  }
   0xd   :  { %25 = dma.hbm_to_vmem [thread:$0]  %s260_s0, 256, %s20_s10, [#allocation4], %s226_s12, %s226_s12, %s227_s13  }
   0xe   :  { %s228_s16 = smov [#allocation6]  }
   0xf   :  { %s35_s17 = sshll.u32 %s228_s16, 4  ;;  %s36_s17 = int_to_ptr.vmem [resolvable:$true] %s35_s17 }
  0x10   :  { %s187_s18 = scalar_lea.vmem %s36_s17, 256  ;;  %p192_p6 = scmp.lt.s32.totalorder %s36_s17, %s36_s17 }
  0x11   :  { %p188_p5 = scmp.ne.s32.totalorder %s36_s17, %s187_s18  ;;  %p193_p7 = scmp.lt.s32.totalorder %s187_s18, %s187_s18 }
  0x13   :  { %p194_p8 = por %p193_p7, %p192_p6 }
  0x15   :  { %p195_p9 = pnand %p194_p8, %p188_p5 }
  0x17   :  { %198 = shalt.err (!%p195_p9)
}
  0x18   :  { %41 = dma.hbm_to_vmem [thread:$0]  %s261_s1, 256, %s36_s17, [#allocation7], %s226_s12, %s226_s12, %s227_s13  }
  0x19   :  { %219 = dma.done.wait [#allocation4], 256  }
  0x1a   :  { %220 = vsyncadd [#allocation4], 4294967040 }
  0x1b   :  { %221 = dma.done.wait [#allocation7], 256  }
  0x1c   :  { %222 = vsyncadd [#allocation7], 4294967040  ;;  %v57_v0 = vld [vmem:[#allocation3] sm:$0xff]  ;;  %v251_v1 = vld [vmem:[#allocation3 + $0x8] sm:$0xff]  ;;  %s229_s0 = smov [#allocation8]  }
  0x1d   :  { %v61_v2 = vand.u32 2147483647, %v57_v0  ;;  %v62_v3 = vand.u32 2147483647, %v251_v1  ;;  %v71_v19 = vmin.f32 %v57_v0, 0.0  ;;  %v72_v22 = vmin.f32 %v251_v1, 0.0 }
  0x1e   :  { %v59_v25 = vld [vmem:[#allocation6] sm:$0xff]  ;;  %vm91_vm0 = vcmp.ge.f32.partialorder %v57_v0, 0.0  ;;  %vm92_vm1 = vcmp.ge.f32.partialorder %v251_v1, 0.0  ;;  %v60_v28 = vld [vmem:[#allocation6 + $0x8] sm:$0xff]  ;;  %s132_s1 = sshll.u32 %s229_s0, 4  ;;  %s133_s1 = int_to_ptr.vmem [resolvable:$true] %s132_s1 }
  0x1f   :  { %v63_v4 = vsub.f32 0.0, %v61_v2  ;;  %v64_v5 = vsub.f32 0.0, %v62_v3  ;;  %v109_v34 = vsub.f32 1.0, %v59_v25  ;;  %v110_v41 = vsub.f32 1.0, %v60_v28  ;;  %s199_s21 = scalar_lea.vmem %s133_s1, 128  ;;  %p204_p11 = scmp.lt.s32.totalorder %s133_s1, %s133_s1 }
  0x20   :  { %p200_p10 = scmp.ne.s32.totalorder %s133_s1, %s199_s21  ;;  %p205_p12 = scmp.lt.s32.totalorder %s199_s21, %s199_s21 }
  0x21   :  { %v65_v6 = vmul.f32 1.442695, %v63_v4  ;;  %v67_v7 = vmul.f32 1.442695, %v64_v5 }
  0x22   :  { %p206_p13 = por %p205_p12, %p204_p11 }
  0x23   :  { %147 = vpow2.f32 %v65_v6 }
  0x24   :  { %149 = vpow2.f32 %v67_v7  ;;  %p207_p0 = pnand %p206_p13, %p200_p10 }
  0x30   :  { %v148_v8 = vpop.eup %147 }
  0x31   :  { %v150_v9 = vpop.eup %149  ;;  %v69_v10 = vadd.f32 1.0, %v148_v8 }
  0x32   :  { %v70_v11 = vadd.f32 1.0, %v150_v9 }
  0x33   :  { %151 = vlog2.f32 %v69_v10 }
  0x34   :  { %153 = vrcp.f32 %v69_v10 }
  0x35   :  { %155 = vrcp.f32 %v70_v11 }
  0x36   :  { %157 = vlog2.f32 %v70_v11 }
  0x40   :  { %v152_v12 = vpop.eup %151 }
  0x41   :  { %v154_v13 = vpop.eup %153  ;;  %v74_v20 = vmul.f32 0.6931472, %v152_v12 }
  0x42   :  { %v156_v14 = vpop.eup %155  ;;  %v83_v15 = vmul.f32 %v154_v13, %v69_v10 }
  0x43   :  { %v158_v16 = vpop.eup %157  ;;  %v84_v17 = vmul.f32 %v156_v14, %v70_v11  ;;  %v77_v29 = vsub.f32 %v71_v19, %v74_v20 }
  0x44   :  { %v85_v18 = vsub.f32 2.0, %v83_v15  ;;  %v76_v23 = vmul.f32 0.6931472, %v158_v16 }
  0x45   :  { %v86_v21 = vsub.f32 2.0, %v84_v17  ;;  %v79_v42 = vsub.f32 %v77_v29, %v57_v0 }
  0x46   :  { %v87_v24 = vmul.f32 %v154_v13, %v85_v18  ;;  %v78_v31 = vsub.f32 %v72_v22, %v76_v23 }
  0x47   :  { %v88_v26 = vmul.f32 %v156_v14, %v86_v21 }
  0x48   :  { %v89_v27 = vmul.f32 %v148_v8, %v87_v24  ;;  %v80_v45 = vsub.f32 %v78_v31, %v251_v1 }
  0x49   :  { %v90_v30 = vmul.f32 %v150_v9, %v88_v26 }
  0x4a   :  { %v93_v32 = vsel %vm91_vm0, %v87_v24, %v89_v27  ;;  %v95_v33 = vsel %vm91_vm0, %v89_v27, %v87_v24 }
  0x4b   :  { %v94_v35 = vsel %vm92_vm1, %v88_v26, %v90_v30  ;;  %v96_v36 = vsel %vm92_vm1, %v90_v30, %v88_v26  ;;  %v97_v37 = vmul.f32 %v95_v33, %v95_v33  ;;  %v99_v38 = vmul.f32 %v93_v32, %v93_v32 }
  0x4c   :  { %v98_v39 = vmul.f32 %v96_v36, %v96_v36  ;;  %v100_v40 = vmul.f32 %v94_v35, %v94_v35 }
  0x4d   :  { %v101_v43 = vmul.f32 -0.75, %v97_v37  ;;  %v107_v44 = vmul.f32 0.25, %v99_v38 }
  0x4e   :  { %v102_v46 = vmul.f32 -0.75, %v98_v39  ;;  %v108_v47 = vmul.f32 0.25, %v100_v40 }
  0x4f   :  { %v103_v48 = vmul.f32 %v101_v43, %v59_v25  ;;  %v111_v49 = vmul.f32 %v109_v34, %v107_v44 }
  0x50   :  { %v104_v50 = vmul.f32 %v102_v46, %v60_v28  ;;  %v112_v51 = vmul.f32 %v110_v41, %v108_v47 }
  0x51   :  { %v105_v52 = vmul.f32 %v103_v48, %v77_v29  ;;  %v113_v53 = vmul.f32 %v111_v49, %v79_v42 }
  0x52   :  { %v106_v54 = vmul.f32 %v104_v50, %v78_v31  ;;  %v114_v55 = vmul.f32 %v112_v51, %v80_v45 }
  0x53   :  { %v115_v56 = vsub.f32 %v105_v52, %v113_v53 }
  0x54   :  { %v116_v57 = vsub.f32 %v106_v54, %v114_v55 }
  0x56   :  { %v118_v58 = vadd.f32 %v116_v57, %v115_v56 }
  0x58   :  { %125 = vst [vmem:[#allocation8] sm:$0xff] %v118_v58 }
  0x59   :  { %210 = shalt.err (!%p207_p0)
}
  0x5a   :  { %135 = dma.vmem_to_hbm [thread:$0]  %s133_s1, 128, %s262_s2, [#allocation5]  }
  0x5b   :  { %223 = dma.done.wait [#allocation5], 128  }
  0x5c   :  { %224 = vsyncadd [#allocation5], 4294967168 }
  0x5d   :  { %139 = vsyncpa [#allocation4], 1 }
  0x5e   :  { %140 = vsyncpa [#allocation7], 1 }
  0x5f   :  { %141 = vsyncpa [#allocation5], 1 }

</bundles_post_ra>
